<compile_context>
chip_gen: v6e
topology: v6e:2x2x1
jax: 0.10.0
libtpu: 0.0.40
codegen_flags: <defaults>
</compile_context>

<pallas_src>
import functools

import jax
import jax.numpy as jnp
from jax.experimental import pallas as pl
from jax.experimental.pallas import tpu as pltpu

_LANES = 128


# --------------------------------------------------------------------------- #
# Kernels
# --------------------------------------------------------------------------- #
def _scale_kernel(fs_ref, scale_ref, out_ref):
    # fs_ref    : (1, 1) f32 in SMEM (forward_scale scalar)
    # scale_ref : (rows, 128) param dtype in VMEM
    # out_ref   : (rows, 128) param dtype in VMEM
    out_ref[...] = (scale_ref[...] * fs_ref[0, 0]).astype(out_ref.dtype)


def _batched_scale_kernel(scale_ref, mult_ref, out_ref):
    # scale_ref : (total_rows, 128) slab of concatenated Scale parameters (VMEM)
    # mult_ref  : (total_rows, 1) per-row forward_scale (VMEM, lane-broadcast)
    # out_ref   : (total_rows, 128)
    out_ref[...] = (scale_ref[...] * mult_ref[...]).astype(out_ref.dtype)


# --------------------------------------------------------------------------- #
# Wrappers
# --------------------------------------------------------------------------- #
@jax.jit
def scale_forward(scale_param: jax.Array, forward_scale) -> jax.Array:
    """Pallas implementation of Scale.forward(): scale_param * forward_scale."""
    dim = scale_param.shape[0]
    dtype = scale_param.dtype
    itemsize = jnp.dtype(dtype).itemsize

    # Lane-dense (rows, 128) slab; pad non-aligned dims (padding sliced off after).
    padded = pl.cdiv(dim, _LANES) * _LANES
    rows = padded // _LANES
    if padded != dim:
        scale_2d = jnp.pad(scale_param, (0, padded - dim)).reshape(rows, _LANES)
    else:
        scale_2d = scale_param.reshape(rows, _LANES)

    fs = jnp.asarray(forward_scale, dtype=jnp.float32).reshape(1, 1)

    out = pl.pallas_call(
        _scale_kernel,
        out_shape=jax.ShapeDtypeStruct((rows, _LANES), dtype),
        in_specs=[
            pl.BlockSpec(memory_space=pltpu.MemorySpace.SMEM),   # forward_scale
            pl.BlockSpec(memory_space=pltpu.MemorySpace.VMEM),   # scale parameter
        ],
        out_specs=pl.BlockSpec(memory_space=pltpu.MemorySpace.VMEM),
        cost_estimate=pl.CostEstimate(
            flops=padded, transcendentals=0, bytes_accessed=2 * padded * itemsize
        ),
    )(fs, scale_2d)
    return out.reshape(padded)[:dim]


@jax.jit
def _batched_scale_call(slab: jax.Array, mult: jax.Array) -> jax.Array:
    total_rows = slab.shape[0]
    dtype = slab.dtype
    itemsize = jnp.dtype(dtype).itemsize
    return pl.pallas_call(
        _batched_scale_kernel,
        out_shape=jax.ShapeDtypeStruct((total_rows, _LANES), dtype),
        in_specs=[
            pl.BlockSpec(memory_space=pltpu.MemorySpace.VMEM),
            pl.BlockSpec(memory_space=pltpu.MemorySpace.VMEM),
        ],
        out_specs=pl.BlockSpec(memory_space=pltpu.MemorySpace.VMEM),
        cost_estimate=pl.CostEstimate(
            flops=total_rows * _LANES,
            transcendentals=0,
            bytes_accessed=2 * total_rows * _LANES * itemsize,
        ),
    )(slab, mult)


def scale_forward_batched(scale_params, forward_scales):
    """Run many Scale modules' forwards in ONE pallas_call.

    Concatenates all parameters into a single lane-dense (total_rows, 128) slab
    with a per-row multiplier, amortizing dispatch + DMA overhead.
    Returns a list of outputs, one per input parameter.
    """
    dtype = scale_params[0].dtype
    slab_rows, mult_rows, dims = [], [], []
    for p, fs in zip(scale_params, forward_scales):
        dim = p.shape[0]
        padded = pl.cdiv(dim, _LANES) * _LANES
        rows = padded // _LANES
        p2d = (jnp.pad(p, (0, padded - dim)) if padded != dim else p).reshape(
            rows, _LANES
        )
        slab_rows.append(p2d.astype(dtype))
        mult_rows.append(jnp.full((rows, 1), fs, dtype=dtype))
        dims.append(dim)

    slab = jnp.concatenate(slab_rows, axis=0)
    mult = jnp.concatenate(mult_rows, axis=0)
    out = _batched_scale_call(slab, mult)

    results, row = [], 0
    for dim in dims:
        rows = pl.cdiv(dim, _LANES)
        results.append(out[row : row + rows].reshape(rows * _LANES)[:dim])
        row += rows
    return results


class Scale:
    """JAX/Pallas port of the nGPT_pytorch Scale module."""

    def __init__(self, dim, init=1.0, scale=1.0):
        self.dim = dim
        # nn.Parameter(torch.ones(dim) * scale)
        self.scale = jnp.ones((dim,), dtype=jnp.float32) * scale
        self.forward_scale = init / scale

    def __call__(self):
        return scale_forward(self.scale, self.forward_scale)


# --------------------------------------------------------------------------- #
# Self-test
# --------------------------------------------------------------------------- #
if __name__ == "__main__":
    key = jax.random.PRNGKey(0)
    k1, k2, k3 = jax.random.split(key, 3)

    # Case 1: small, non-128-aligned dim (exercises the pad-to-128 path).
    dim_small = 32
    scale_val = 1.0 / (dim_small ** 0.5)
    mod_small = Scale(dim_small, init=1.0, scale=scale_val)
    mod_small.scale = mod_small.scale + 0.01 * jax.random.normal(
        k1, (dim_small,), dtype=jnp.float32
    )
    out_small = mod_small()
    jax.block_until_ready(out_small)
    ref_small = mod_small.scale * jnp.float32(mod_small.forward_scale)
    assert out_small.shape == (dim_small,)
    assert out_small.dtype == jnp.float32
    assert jnp.allclose(out_small, ref_small, atol=1e-6, rtol=1e-6)

    # Case 2: 128-aligned dim (lane/sublane-dense path, no padding).
    dim_big = 256
    scale_val_big = 1.0 / (dim_big ** 0.5)
    mod_big = Scale(dim_big, init=1.0, scale=scale_val_big)
    mod_big.scale = mod_big.scale + 0.01 * jax.random.normal(
        k2, (dim_big,), dtype=jnp.float32
    )
    out_big = mod_big()
    jax.block_until_ready(out_big)
    ref_big = mod_big.scale * jnp.float32(mod_big.forward_scale)
    assert out_big.shape == (dim_big,)
    assert out_big.dtype == jnp.float32
    assert jnp.allclose(out_big, ref_big, atol=1e-6, rtol=1e-6)

    # Case 2b: same shapes, different forward_scale values -> must NOT retrace
    # (forward_scale is a traced SMEM scalar, not a baked constant).
    mod_big2 = Scale(dim_big, init=0.5, scale=0.125)
    mod_big2.scale = mod_big.scale  # reuse perturbed params
    out_big2 = mod_big2()
    jax.block_until_ready(out_big2)
    ref_big2 = mod_big2.scale * jnp.float32(mod_big2.forward_scale)
    assert jnp.allclose(out_big2, ref_big2, atol=1e-6, rtol=1e-6)

    # Case 3: batched path -- several Scale modules in one pallas_call.
    mods = [
        Scale(128, init=1.0, scale=1.0 / (128 ** 0.5)),
        Scale(384, init=1.0, scale=0.25),
        Scale(48, init=0.5, scale=1.0),
    ]
    for i, m in enumerate(mods):
        m.scale = m.scale + 0.01 * jax.random.normal(
            jax.random.fold_in(k3, i), (m.dim,), dtype=jnp.float32
        )
    outs = scale_forward_batched([m.scale for m in mods],
                                 [m.forward_scale for m in mods])
    jax.block_until_ready(outs)
    for m, o in zip(mods, outs):
        ref = m.scale * jnp.float32(m.forward_scale)
        assert o.shape == (m.dim,)
        assert jnp.allclose(o, ref, atol=1e-6, rtol=1e-6)

    print("KERNEL_OK")
</pallas_src>

<mosaic_0001>
module attributes {stable_mosaic.version = 11 : i64} {
  func.func @_scale_kernel(%arg0: memref<1x1xf32, #tpu.memory_space<smem>>, %arg1: memref<1x128xf32, #tpu.memory_space<vmem>>, %arg2: memref<1x128xf32, #tpu.memory_space<vmem>>) attributes {dimension_semantics = [], scalar_prefetch = 0 : i64, scratch_operands = 0 : i64, tpu.core_type = #tpu.core_type<tc>} {
    %c0 = arith.constant 0 : index
    %c0_0 = arith.constant 0 : index
    %0 = vector.load %arg1[%c0, %c0_0] : memref<1x128xf32, #tpu.memory_space<vmem>>, vector<1x128xf32>
    %c0_1 = arith.constant 0 : index
    %c0_2 = arith.constant 0 : index
    %1 = memref.load %arg0[%c0_1, %c0_2] : memref<1x1xf32, #tpu.memory_space<smem>>
    %2 = vector.broadcast %1 : f32 to vector<1x128xf32>
    %3 = arith.mulf %0, %2 : vector<1x128xf32>
    %c0_3 = arith.constant 0 : index
    %c0_4 = arith.constant 0 : index
    %4 = vector.load %arg2[%c0_3, %c0_4] : memref<1x128xf32, #tpu.memory_space<vmem>>, vector<1x128xf32>
    tpu.vector_store %arg2[%c0_3, %c0_4], %3 {strides = array<i32>} : memref<1x128xf32, #tpu.memory_space<vmem>>, vector<1x128xf32>,
    return
  }
}

</mosaic_0001>

<bundles_post_ra>
// kernel: scale_forward.1
= control target key start
LH: loop header
LB: loop body
LE: loop exit
PB: predicated region body
PF: predicated region fallthrough
CT: control target
= control target key end

     0   :  { %s45_s0 = inlined_call_operand.<no memory space> [shape: f32[1,1], index: 0, kind: input, shape index: {}]   ;;  %s46_s1 = inlined_call_operand.vmem [shape: f32[1,128], index: 1, kind: input, shape index: {}]   ;;  %s47_s2 = inlined_call_operand.vmem [shape: f32[1,128], index: 2, kind: output, shape index: {}]  }
   0x1   :  { %v12_v0 = vld [vmem:[%s46_s1] sm:$0x1]  ;;  %v14_v1 = vstv %s45_s0 }
   0x2   :  { %v15_v2 = vmul.f32 %v14_v1, %v12_v0 }
   0x4   :  { %16 = vst [vmem:[%s47_s2] sm:$0x1] %v15_v2 }

</bundles_post_ra>
